<compile_context>
chip_gen: v5e
topology: v5e:2x2
jax: 0.10.0
libtpu: 0.0.40
codegen_flags: <defaults>
</compile_context>

<pallas_src>
import numpy as np
import jax
import jax.numpy as jnp
from jax import lax
from jax.experimental import pallas as pl
from jax.experimental.pallas import tpu as pltpu


def _round_up(x, m):
    return ((x + m - 1) // m) * m


def _freq_table(pos_length, pos_start):
    """Exact f32 frequencies 2**l * pi (shared by kernel and reference)."""
    idx = np.arange(pos_start, pos_start + pos_length, dtype=np.float32)
    return np.exp2(idx) * np.float32(np.pi)          # (L,) float32, 2**l exact


def _pos_enc_kernel(pos_ref, sel_ref, freq_ref, phase_ref, out_ref):
    # pos_ref  : (TN, D)  f32 flattened positions
    # sel_ref  : (D, W)   f32 0/1 selector: lane -> driving coordinate
    # freq_ref : (1, W)   f32 per-lane frequency
    # phase_ref: (1, W)   f32 per-lane phase (pi/2 on cos lanes, 0 on sin lanes)
    # out_ref  : (TN, W)  lane-dense flat embedding tile (W multiple of 128)
    #
    # Coordinate "gather" on the MXU (vector-extended slot); the 0/1 selector with
    # HIGHEST precision keeps the gathered pos values exact.
    p_g = jnp.dot(pos_ref[...], sel_ref[...],
                  precision=lax.Precision.HIGHEST,
                  preferred_element_type=jnp.float32)            # (TN, W)
    # VPU: same f32 bits as freq[j] * pos[:, d] in the reference, plus the phase.
    arg = p_g * freq_ref[...] + phase_ref[...]
    # Single EUP transcendental per element, then one full-width unmasked store.
    out_ref[...] = jnp.sin(arg).astype(out_ref.dtype)


def positional_encoder(pos, num_features, pos_length=32, pos_start=0,
                       tile_n=1024, out_dtype=jnp.float32,
                       vmem_budget_bytes=16 * 1024 * 1024):
    """JAX/Pallas equivalent of Positional_Encoder.forward."""
    orig_shape = pos.shape
    d = int(orig_shape[-1])
    two_l = 2 * pos_length

    # Only compute the features that survive the trailing [..., :num_features] slice.
    n_keep = min(int(num_features), d * two_l)
    d_used = -(-n_keep // two_l)                     # ceil(n_keep / 2L) driving coords
    w = d_used * two_l                               # live lanes
    w_pad = _round_up(w, 128)                        # full-width unmasked stores

    flat = pos.reshape(-1, d).astype(jnp.float32)    # (N, D)
    n = flat.shape[0]
    out_itemsize = jnp.dtype(out_dtype).itemsize

    # ---- Row-tile selection: VMEM budget + >= 4 grid steps for big problems. ----
    # Double-buffered input + output blocks plus ~3 f32 (tile, W) temporaries.
    per_row_bytes = 2 * d * 4 + 2 * w_pad * out_itemsize + 3 * w_pad * 4
    vmem_tile = max(8, (vmem_budget_bytes // per_row_bytes) // 8 * 8)
    n8 = _round_up(n, 8)
    tile = min(int(tile_n), n8, vmem_tile)
    min_steps, min_tile = 4, 256                     # keep both v7x TensorCores busy
    if tile * min_steps > n8 and n8 >= min_steps * min_tile:
        tile = max(min_tile, (n8 // min_steps) // 8 * 8)
    tile = max(8, (tile // 8) * 8)

    n_pad = _round_up(n, tile)
    if n_pad != n:
        flat = jnp.pad(flat, ((0, n_pad - n), (0, 0)))

    # ---- Host-built lane tables: frequency, phase, 0/1 coordinate selector. ----
    freq = _freq_table(pos_length, pos_start)                           # (L,)
    lane = np.arange(w_pad)
    j = lane % two_l                                                    # pos in 2L block
    coord = lane // two_l                                               # driving coordinate
    valid = lane < w
    freq_w = np.where(valid,
                      freq[np.where(j < pos_length, j, j - pos_length)],
                      np.float32(0.0)).astype(np.float32)
    phase_w = np.where(valid & (j < pos_length), np.float32(np.pi / 2),
                       np.float32(0.0)).astype(np.float32)
    sel = np.zeros((d, w_pad), np.float32)
    sel[coord[valid], lane[valid]] = np.float32(1.0)

    freq_w = jnp.asarray(freq_w.reshape(1, w_pad))
    phase_w = jnp.asarray(phase_w.reshape(1, w_pad))
    sel = jnp.asarray(sel)

    cost = pl.CostEstimate(
        flops=int(2 * n_pad * d * w_pad + 2 * n_pad * w_pad),
        transcendentals=int(n_pad * w_pad),
        bytes_accessed=int(4 * n_pad * d + out_itemsize * n_pad * w_pad
                           + 4 * (d + 2) * w_pad),
    )

    emb = pl.pallas_call(
        _pos_enc_kernel,
        out_shape=jax.ShapeDtypeStruct((n_pad, w_pad), out_dtype),
        grid=(n_pad // tile,),
        in_specs=[
            pl.BlockSpec((tile, d), lambda i: (i, 0)),
            pl.BlockSpec((d, w_pad), lambda i: (0, 0)),
            pl.BlockSpec((1, w_pad), lambda i: (0, 0)),
            pl.BlockSpec((1, w_pad), lambda i: (0, 0)),
        ],
        out_specs=pl.BlockSpec((tile, w_pad), lambda i: (i, 0)),
        compiler_params=pltpu.CompilerParams(
            dimension_semantics=("parallel",),
            vmem_limit_bytes=32 * 1024 * 1024,
        ),
        cost_estimate=cost,
    )(flat, sel, freq_w, phase_w)                     # (n_pad, W_pad)

    emb = emb[:n, :n_keep]                            # drop padded rows / pad lanes
    return emb.reshape(*orig_shape[:-1], n_keep)


def _reference(pos, num_features, pos_length=32, pos_start=0):
    """Pure-JAX reference mirroring the PyTorch forward (same exact freq table)."""
    orig_shape = pos.shape
    flat = pos.reshape(-1, orig_shape[-1]).astype(jnp.float32)
    freq = jnp.asarray(_freq_table(pos_length, pos_start))
    arg = freq.reshape(1, 1, -1) * flat[..., None]
    emb = jnp.concatenate([jnp.cos(arg), jnp.sin(arg)], axis=-1)
    emb = emb.reshape(*orig_shape[:-1], -1)
    return emb[..., :num_features]


if __name__ == "__main__":
    # Small pos_length keeps the f32 sin/cos arguments well-conditioned so the
    # kernel-vs-reference tolerance comparison is meaningful (at 2**31 * pi * x both
    # sides are implementation-defined f32 range-reduction noise).
    key_a, key_b = jax.random.split(jax.random.PRNGKey(0))

    # Config A: batch=2, seq=8, coord_dim=3; keep 40 of the 3*16=48 features.
    pos_a = jax.random.uniform(key_a, (2, 8, 3), dtype=jnp.float32)
    out_a = jax.block_until_ready(positional_encoder(pos_a, 40, pos_length=8))
    ref_a = _reference(pos_a, 40, pos_length=8)
    assert out_a.shape == (2, 8, 40), out_a.shape
    assert jnp.allclose(out_a, ref_a, atol=2e-3, rtol=0.0), "config A mismatch"

    # Config B: only the first coordinate's features are kept -> kernel trims work.
    pos_b = jax.random.uniform(key_b, (4, 5, 2), dtype=jnp.float32)
    out_b = jax.block_until_ready(positional_encoder(pos_b, 16, pos_length=8))
    ref_b = _reference(pos_b, 16, pos_length=8)
    assert out_b.shape == (4, 5, 16), out_b.shape
    assert jnp.allclose(out_b, ref_b, atol=2e-3, rtol=0.0), "config B mismatch"

    print("KERNEL_OK")
</pallas_src>

<mosaic_0001>
module attributes {stable_mosaic.version = 11 : i64} {
  func.func @_pos_enc_kernel(%arg0: i32, %arg1: memref<16x3xf32, #tpu.memory_space<vmem>>, %arg2: memref<3x128xf32, #tpu.memory_space<vmem>>, %arg3: memref<1x128xf32, #tpu.memory_space<vmem>>, %arg4: memref<1x128xf32, #tpu.memory_space<vmem>>, %arg5: memref<16x128xf32, #tpu.memory_space<vmem>>) attributes {dimension_semantics = [#tpu.dimension_semantics<parallel>], iteration_bounds = array<i64: 1>, scalar_prefetch = 0 : i64, scratch_operands = 0 : i64, tpu.core_type = #tpu.core_type<tc>, window_params = [{transform_indices = @transform_0, window_bounds = array<i64: 16, 3>}, {pipeline_mode = #tpu.pipeline_mode<synchronous>, transform_indices = @transform_1, window_bounds = array<i64: 3, 128>}, {pipeline_mode = #tpu.pipeline_mode<synchronous>, transform_indices = @transform_2, window_bounds = array<i64: 1, 128>}, {pipeline_mode = #tpu.pipeline_mode<synchronous>, transform_indices = @transform_3, window_bounds = array<i64: 1, 128>}, {transform_indices = @transform_4, window_bounds = array<i64: 16, 128>}]} {
    %c0 = arith.constant 0 : index
    %c0_0 = arith.constant 0 : index
    %0 = vector.load %arg1[%c0, %c0_0] : memref<16x3xf32, #tpu.memory_space<vmem>>, vector<16x3xf32>
    %c0_1 = arith.constant 0 : index
    %c0_2 = arith.constant 0 : index
    %1 = vector.load %arg2[%c0_1, %c0_2] : memref<3x128xf32, #tpu.memory_space<vmem>>, vector<3x128xf32>
    %cst = arith.constant dense<0.000000e+00> : vector<16x128xf32>
    %2 = tpu.matmul %0, %1, %cst {dimension_numbers = #tpu.dot_dimension_numbers<[1], [0], [0], [1], [0, 0, 1, 1], [], []>, precision = #tpu.contract_precision<fp32>} : vector<16x3xf32>, vector<3x128xf32>, vector<16x128xf32> -> vector<16x128xf32>
    %c0_3 = arith.constant 0 : index
    %c0_4 = arith.constant 0 : index
    %3 = vector.load %arg3[%c0_3, %c0_4] : memref<1x128xf32, #tpu.memory_space<vmem>>, vector<1x128xf32>
    %4 = vector.broadcast %3 : vector<1x128xf32> to vector<16x128xf32>
    %5 = arith.mulf %2, %4 : vector<16x128xf32>
    %c0_5 = arith.constant 0 : index
    %c0_6 = arith.constant 0 : index
    %6 = vector.load %arg4[%c0_5, %c0_6] : memref<1x128xf32, #tpu.memory_space<vmem>>, vector<1x128xf32>
    %7 = vector.broadcast %6 : vector<1x128xf32> to vector<16x128xf32>
    %8 = arith.addf %5, %7 : vector<16x128xf32>
    %9 = math.sin %8 : vector<16x128xf32>
    %c0_7 = arith.constant 0 : index
    %c0_8 = arith.constant 0 : index
    %10 = vector.load %arg5[%c0_7, %c0_8] : memref<16x128xf32, #tpu.memory_space<vmem>>, vector<16x128xf32>
    tpu.vector_store %arg5[%c0_7, %c0_8], %9 {strides = array<i32>} : memref<16x128xf32, #tpu.memory_space<vmem>>, vector<16x128xf32>,
    return
  }
  func.func @transform_0(%arg0: i32) -> (i32, i32) {
    %c0_i32 = arith.constant 0 : i32
    %c0_i32_0 = arith.constant 0 : i32
    return %arg0, %c0_i32 : i32, i32
  }
  func.func @transform_1(%arg0: i32) -> (i32, i32) {
    %c0_i32 = arith.constant 0 : i32
    %c0_i32_0 = arith.constant 0 : i32
    %c0_i32_1 = arith.constant 0 : i32
    return %c0_i32, %c0_i32_0 : i32, i32
  }
  func.func @transform_2(%arg0: i32) -> (i32, i32) {
    %c0_i32 = arith.constant 0 : i32
    %c0_i32_0 = arith.constant 0 : i32
    %c0_i32_1 = arith.constant 0 : i32
    return %c0_i32, %c0_i32_0 : i32, i32
  }
  func.func @transform_3(%arg0: i32) -> (i32, i32) {
    %c0_i32 = arith.constant 0 : i32
    %c0_i32_0 = arith.constant 0 : i32
    %c0_i32_1 = arith.constant 0 : i32
    return %c0_i32, %c0_i32_0 : i32, i32
  }
  func.func @transform_4(%arg0: i32) -> (i32, i32) {
    %c0_i32 = arith.constant 0 : i32
    %c0_i32_0 = arith.constant 0 : i32
    return %arg0, %c0_i32 : i32, i32
  }
}

</mosaic_0001>

<bundles_post_ra>
// kernel: tpu_custom_call.1
= control target key start
LH: loop header
LB: loop body
LE: loop exit
PB: predicated region body
PF: predicated region fallthrough
CT: control target
= control target key end

     0   :  { %vm28_vm0 = vcmask 1042432   ;;  %vm21_vm1 = vcmask 23552   ;;  %s791_s0 = inlined_call_operand.vmem [shape: f32[16,3], index: 0, kind: input, shape index: {}]   ;;  %s792_s1 = inlined_call_operand.vmem [shape: f32[3,128], index: 1, kind: input, shape index: {}]   ;;  %s793_s2 = inlined_call_operand.vmem [shape: f32[1,128], index: 2, kind: input, shape index: {}]   ;;  %s794_s3 = inlined_call_operand.vmem [shape: f32[1,128], index: 3, kind: input, shape index: {}]   ;;  %s795_s4 = inlined_call_operand.hbm [shape: f32[16,128], index: 4, kind: output, shape index: {}]  }
   0x1   :  { %v20_v0 = vld [vmem:[%s792_s1] sm:$0x7]  ;;  %v19_v1 = vld [vmem:[%s791_s0 + $0x8] sm:$0xff] }
   0x2   :  { %v18_v2 = vld [vmem:[%s791_s0] sm:$0xff]  ;;  %v30_v3 = vsel %vm28_vm0, %v20_v0, 0  ;;  %v26_v4 = vsel %vm21_vm1, %v19_v1, 0 }
   0x3   :  { %v23_v5 = vsel %vm21_vm1, %v18_v2, 0  ;;  %v47_v6 = vand.u32 4294901760, %v30_v3  ;;  %v57_v7 = vand.u32 4294901760, %v26_v4 }
   0x4   :  { %v49_v8 = vand.u32 4294901760, %v23_v5 }
   0x5   :  { %9 = vsyncpa [#allocation3], 0  ;;  %557 = vmatpush.msra.mxu2 %v47_v6  ;;  %v58_v9 = vsub.f32 %v26_v4, %v57_v7  ;;  %v82_v10 = vsub.f32 %v30_v3, %v47_v6  ;;  %48 = vmatpush.msra.mxu0 %v47_v6  ;;  %v569_v33 = vld [vmem:[%s793_s2] ss:$0 sm:$0xff]  ;;  %v597_v2 = vmov 683565275  }
   0x6   :  { %v50_v11 = vsub.f32 %v23_v5, %v49_v8  ;;  %v570_v36 = vld [vmem:[%s794_s3] ss:$0 sm:$0xff]  ;;  %v598_v4 = vmov 2475754826   ;;  %s604_s2 = smov [#allocation2]   ;;  %s539_s25 = sshll.u32 %s795_s4, 4  ;;  %s540_s25 = int_to_ptr.hbm [resolvable:$true] %s539_s25 }
   0x7   :  { %v59_v12 = vand.u32 4294901760, %v58_v9  ;;  %v83_v13 = vand.u32 4294901760, %v82_v10  ;;  %113 = vmatpush.msrb.mxu2 %v82_v10  ;;  %s537_s3 = sshll.u32 %s604_s2, 4  ;;  %s605_s26 = smov 128   ;;  %s538_s3 = int_to_ptr.vmem [resolvable:$true] %s537_s3 }
   0x8   :  { %v51_v14 = vand.u32 4294901760, %v50_v11  ;;  %s606_s27 = smov 8  }
   0x9   :  { %v60_v15 = vsub.f32 %v58_v9, %v59_v12  ;;  %v84_v16 = vsub.f32 %v82_v10, %v83_v13  ;;  %173 = vmatpush.msrb.mxu0 %v83_v13 }
   0xa   :  { %v52_v17 = vsub.f32 %v50_v11, %v51_v14 }
   0xb   :  { %v61_v18 = vand.u32 4294901760, %v60_v15  ;;  %v85_v19 = vand.u32 4294901760, %v84_v16 }
   0xc   :  { %v53_v20 = vand.u32 4294901760, %v52_v17  ;;  %v602_v17 = vmov 1326507024  }
   0xd   :  { %62 = vmatmul.f32.vlgmr.msra.gmra.mxu2 %v61_v18  ;;  %558 = vmatpush.msra.mxu3 %v85_v19 }
   0xe   :  { %92 = vmatmul.f32.vlgmr.msra.gmra.mxu3 %v57_v7  ;;  %86 = vmatpush.msra.mxu1 %v85_v19 }
   0xf   :  { %141 = vmatpush.msrb.mxu3 %v47_v6  ;;  %54 = vmatmul.f32.vlgmr.msra.gmra.mxu0 %v53_v20 }
  0x10   :  { %88 = vmatmul.f32.vlgmr.msra.gmra.mxu1 %v49_v8 }
  0x11   :  { %199 = vmatpush.msrb.mxu1 %v47_v6 }
  0x15   :  { %116 = vmatmul.f32.vlgmr.msrb.gmra.mxu2 %v50_v11  ;;  %v600_v11 = vmov 2102212464  }
  0x16   :  { %145 = vmatmul.f32.vlgmr.msrb.gmra.mxu3 %v51_v14  ;;  %v601_v14 = vmov 920167782  }
  0x17   :  { %175 = vmatmul.f32.vlgmr.msrb.gmra.mxu0 %v49_v8 }
  0x18   :  { %201 = vmatmul.f32.vlgmr.msrb.gmra.mxu1 %v49_v8  ;;  %v599_v8 = vmov 2131351028  }
  0x1d   :  { %121 = vmatmul.f32.gmra.mxu2 %v58_v9 }
  0x1e   :  { %151 = vmatmul.f32.gmra.mxu3 %v59_v12 }
  0x1f   :  { %179 = vmatmul.f32.gmra.mxu0 %v57_v7 }
  0x20   :  { %205 = vmatmul.f32.gmra.mxu1 %v57_v7 }
  0x8c   :  { %v55_v21 = vpop.f32.mrf.mxu0 }
  0x8d   :  { %v89_v24 = vpop.f32.mrf.mxu1 }
  0x8e   :  { %v90_v25 = vadd.f32 %v89_v24, %v55_v21 }
  0x90   :  { %v63_v22 = vpop.f32.mrf.mxu2 }
  0x91   :  { %v93_v23 = vpop.f32.mrf.mxu3 }
  0x92   :  { %v94_v34 = vadd.f32 %v93_v23, %v63_v22 }
  0x94   :  { %v176_v27 = vpop.f32.mrf.mxu0 }
  0x95   :  { %v202_v30 = vpop.f32.mrf.mxu1 }
  0x98   :  { %v117_v26 = vpop.f32.mrf.mxu2 }
  0x99   :  { %v118_v28 = vadd.f32 %v117_v26, %v90_v25  ;;  %v146_v29 = vpop.f32.mrf.mxu3 }
  0x9b   :  { %v147_v31 = vadd.f32 %v146_v29, %v118_v28 }
  0x9c   :  { %v180_v41 = vpop.f32.mrf.mxu0 }
  0x9d   :  { %v177_v32 = vadd.f32 %v176_v27, %v147_v31  ;;  %v206_v44 = vpop.f32.mrf.mxu1 }
  0x9f   :  { %v203_v35 = vadd.f32 %v202_v30, %v177_v32 }
  0xa0   :  { %v122_v37 = vpop.f32.mrf.mxu2 }
  0xa1   :  { %v213_v38 = vmul.f32 %v569_v33, %v203_v35  ;;  %v123_v39 = vadd.f32 %v122_v37, %v94_v34  ;;  %v152_v40 = vpop.f32.mrf.mxu3 }
  0xa3   :  { %v647_v42 = vadd.f32 %v570_v36, %v213_v38  ;;  %v153_v43 = vadd.f32 %v152_v40, %v123_v39 }
  0xa5   :  { %v221_v45 = vand.u32 2147483647, %v647_v42  ;;  %v224_v46 = vand.u32 2139095040, %v647_v42  ;;  %v181_v47 = vadd.f32 %v180_v41, %v153_v43 }
  0xa7   :  { %v225_v48 = vshrl.u32 %v224_v46, 23  ;;  %v228_v49 = vand.u32 8388607, %v221_v45  ;;  %v207_v50 = vadd.f32 %v206_v44, %v181_v47 }
  0xa9   :  { %v551_v51 = vadd.s32 4294967169, %v225_v48  ;;  %v229_v52 = vor.u32 8388608, %v228_v49  ;;  %v214_v53 = vmul.f32 %v569_v33, %v207_v50 }
  0xab   :  { %v231_v54 = vadd.s32 1, %v551_v51  ;;  %v653_v55 = vadd.f32 %v570_v36, %v214_v53  ;;  %v655_v56 = vshll.u32 %v229_v52, 8 }
  0xad   :  { %vm232_vm2 = vcmp.gt.s32.totalorder %v231_v54, 0  ;;  %v376_v58 = vand.u32 2147483647, %v653_v55  ;;  %v379_v59 = vand.u32 2139095040, %v653_v55  ;;  %v270_v62 = vand.u32 65535, %v655_v56 }
  0xae   :  { %v233_v57 = vsel %vm232_vm2, %v231_v54, 0  ;;  %v271_v63 = vshrl.u32 %v655_v56, 16 }
  0xaf   :  { %v235_v60 = vand.u32 31, %v233_v57  ;;  %v380_v0 = vshrl.u32 %v379_v59, 23  ;;  %v234_v1 = vshrl.u32 %v233_v57, 5  ;;  %v665_v6 = vand.u32 8388607, %v376_v58 }
  0xb1   :  { %v236_v61 = vsub.s32 32, %v235_v60  ;;  %v238_v3 = vshll.u32 %v597_v2, %v235_v60  ;;  %v241_v5 = vshll.u32 %v598_v4, %v235_v60  ;;  %v244_v10 = vshll.u32 %v599_v8, %v235_v60 }
  0xb2   :  { %v247_v13 = vshll.u32 %v600_v11, %v235_v60  ;;  %v250_v16 = vshll.u32 %v601_v14, %v235_v60  ;;  %v554_v22 = vadd.s32 4294967169, %v380_v0  ;;  %vm253_vm3 = vcmp.lt.s32.totalorder %v234_v1, 1 }
  0xb3   :  { %v239_v7 = vshrl.u32 %v598_v4, %v236_v61  ;;  %v242_v9 = vshrl.u32 %v599_v8, %v236_v61  ;;  %v245_v12 = vshrl.u32 %v600_v11, %v236_v61  ;;  %v248_v15 = vshrl.u32 %v601_v14, %v236_v61 }
  0xb4   :  { %v251_v18 = vshrl.u32 %v602_v17, %v236_v61  ;;  %vm256_vm4 = vcmp.lt.s32.totalorder %v234_v1, 4  ;;  %v237_v25 = vshrl.u32 %v597_v2, %v236_v61  ;;  %vm255_vm5 = vcmp.lt.s32.totalorder %v234_v1, 3 }
  0xb5   :  { %v240_v19 = vor.u32 %v239_v7, %v238_v3  ;;  %v243_v20 = vor.u32 %v242_v9, %v241_v5  ;;  %v246_v21 = vor.u32 %v245_v12, %v244_v10  ;;  %v249_v23 = vor.u32 %v248_v15, %v247_v13 }
  0xb6   :  { %v252_v24 = vor.u32 %v251_v18, %v250_v16  ;;  %v386_v31 = vadd.s32 1, %v554_v22  ;;  %vm254_vm6 = vcmp.lt.s32.totalorder %v234_v1, 2  ;;  %v384_v43 = vor.u32 8388608, %v665_v6 }
  0xb7   :  { %v258_v26 = vsel %vm256_vm4, %v246_v21, 2102212464  ;;  %v261_v27 = vsel %vm253_vm3, %v240_v19, %v243_v20  ;;  %v265_v28 = vsel %vm253_vm3, %v243_v20, %v246_v21  ;;  %v262_v29 = vsel %vm256_vm4, %v249_v23, 920167782 }
  0xb8   :  { %v266_v30 = vsel %vm256_vm4, %v252_v24, 1326507024  ;;  %v257_v32 = vsel %vm253_vm3, %v237_v25, %v240_v19  ;;  %v263_v33 = vsel %vm255_vm5, %v246_v21, %v262_v29  ;;  %v259_v35 = vsel %vm255_vm5, %v243_v20, %v258_v26 }
  0xb9   :  { %v267_v34 = vsel %vm255_vm5, %v249_v23, %v266_v30  ;;  %v264_v36 = vsel %vm254_vm6, %v261_v27, %v263_v33  ;;  %vm387_vm7 = vcmp.gt.s32.totalorder %v386_v31, 0  ;;  %v677_v44 = vsel %vm254_vm6, %v257_v32, %v259_v35 }
  0xba   :  { %v268_v37 = vsel %vm254_vm6, %v265_v28, %v267_v34  ;;  %v294_v40 = vand.u32 65535, %v264_v36  ;;  %v295_v41 = vshrl.u32 %v264_v36, 16  ;;  %v388_v48 = vsel %vm387_vm7, %v386_v31, 0 }
  0xbb   :  { %v272_v38 = vand.u32 65535, %v268_v37  ;;  %v273_v39 = vshrl.u32 %v268_v37, 16  ;;  %v390_v6 = vand.u32 31, %v388_v48  ;;  %v603_v7 = vmov 0  }
  0xbc   :  { %v297_v51 = vmul.u32 %v295_v41, %v270_v62  ;;  %v298_v52 = vmul.u32 %v294_v40, %v271_v63  ;;  %v296_v57 = vmul.u32 %v294_v40, %v270_v62  ;;  %v299_v59 = vmul.u32 %v295_v41, %v271_v63 }
  0xbd   :  { %v275_v46 = vmul.u32 %v273_v39, %v270_v62  ;;  %v276_v47 = vmul.u32 %v272_v38, %v271_v63  ;;  %v274_v49 = vmul.u32 %v272_v38, %v270_v62  ;;  %v277_v50 = vmul.u32 %v273_v39, %v271_v63 }
  0xbe   :  { %v300_v0 = vshll.u32 %v297_v51, 16  ;;  %v301_v1 = vshrl.u32 %v297_v51, 16  ;;  %v302_v5 = vshll.u32 %v298_v52, 16  ;;  %v303_v10 = vshrl.u32 %v298_v52, 16 }
  0xbf   :  { %v278_v53 = vshll.u32 %v275_v46, 16  ;;  %v279_v54 = vshrl.u32 %v275_v46, 16  ;;  %v280_v60 = vshll.u32 %v276_v47, 16  ;;  %v281_v61 = vshrl.u32 %v276_v47, 16 }
  0xc0   :  { %vm304_vm9 = vc.u32 %v296_v57, %v300_v0  ;;  %v306_v12 = vadd.s32 %v300_v0, %v296_v57  ;;  %v681_v62 = vsub.s32 32, %v390_v6  ;;  %v684_v18 = vshrl.u32 %v388_v48, 5 }
  0xc1   :  { %vm282_vm8 = vc.u32 %v274_v49, %v278_v53  ;;  %v284_v3 = vadd.s32 %v278_v53, %v274_v49  ;;  %v305_v15 = vsel %vm304_vm9, 1, %v603_v7  ;;  %v393_v22 = vshll.u32 %v597_v2, %v390_v6 }
  0xc2   :  { %v283_v9 = vsel %vm282_vm8, 1, %v603_v7  ;;  %v307_v16 = vadd.s32 %v305_v15, %v299_v59  ;;  %vm308_vm11 = vc.u32 %v306_v12, %v302_v5  ;;  %v687_v21 = vadd.s32 %v306_v12, %v302_v5 }
  0xc3   :  { %v285_v13 = vadd.s32 %v283_v9, %v277_v50  ;;  %vm286_vm10 = vc.u32 %v284_v3, %v280_v60  ;;  %v309_v20 = vsel %vm308_vm11, 1, %v603_v7  ;;  %v394_v24 = vshrl.u32 %v598_v4, %v681_v62 }
  0xc4   :  { %v287_v63 = vsel %vm286_vm10, 1, %v603_v7  ;;  %v311_v23 = vadd.s32 %v309_v20, %v307_v16  ;;  %v396_v25 = vshll.u32 %v598_v4, %v390_v6  ;;  %v397_v26 = vshrl.u32 %v599_v8, %v681_v62 }
  0xc5   :  { %v289_v19 = vadd.s32 %v287_v63, %v285_v13  ;;  %v399_v28 = vshll.u32 %v599_v8, %v390_v6  ;;  %v400_v29 = vshrl.u32 %v600_v11, %v681_v62  ;;  %v402_v30 = vshll.u32 %v600_v11, %v390_v6 }
  0xc6   :  { %v312_v31 = vadd.s32 %v311_v23, %v301_v1  ;;  %v699_v32 = vor.u32 %v394_v24, %v393_v22  ;;  %v701_v33 = vor.u32 %v397_v26, %v396_v25  ;;  %v403_v34 = vshrl.u32 %v601_v14, %v681_v62 }
  0xc7   :  { %v290_v27 = vadd.s32 %v289_v19, %v279_v54  ;;  %v401_v35 = vor.u32 %v400_v29, %v399_v28  ;;  %v405_v36 = vshll.u32 %v601_v14, %v390_v6  ;;  %v406_v8 = vshrl.u32 %v602_v17, %v681_v62 }
  0xc8   :  { %v313_v37 = vadd.s32 %v312_v31, %v303_v10  ;;  %v404_v38 = vor.u32 %v403_v34, %v402_v30  ;;  %vm408_vm13 = vcmp.lt.s32.totalorder %v684_v18, 1  ;;  %v713_v39 = vshll.u32 %v384_v43, 8 }
  0xc9   :  { %v705_v4 = vadd.s32 %v290_v27, %v281_v61  ;;  %v407_v11 = vor.u32 %v406_v8, %v405_v36  ;;  %v314_v40 = vmul.u32 %v655_v56, %v677_v44  ;;  %vm411_vm14 = vcmp.lt.s32.totalorder %v684_v18, 4 }
  0xca   :  { %v317_v41 = vadd.s32 1, %v313_v37  ;;  %v416_v14 = vsel %vm408_vm13, %v699_v32, %v701_v33  ;;  %vm410_vm15 = vcmp.lt.s32.totalorder %v684_v18, 3  ;;  %v417_v17 = vsel %vm411_vm14, %v404_v38, 920167782 }
  0xcb   :  { %vm316_vm12 = vc.u32 %v705_v4, %v687_v21  ;;  %v420_v43 = vsel %vm408_vm13, %v701_v33, %v401_v35  ;;  %v421_v56 = vsel %vm411_vm14, %v407_v11, 1326507024  ;;  %vm409_vm0 = vcmp.lt.s32.totalorder %v684_v18, 2 }
  0xcc   :  { %v318_v44 = vsel %vm316_vm12, %v317_v41, %v313_v37  ;;  %v418_v46 = vsel %vm410_vm15, %v401_v35, %v417_v17  ;;  %v422_v47 = vsel %vm410_vm15, %v404_v38, %v421_v56  ;;  %v425_v51 = vand.u32 65535, %v713_v39 }
  0xcd   :  { %v319_v48 = vadd.s32 %v318_v44, %v314_v40  ;;  %v419_v49 = vsel %vm409_vm0, %v416_v14, %v418_v46  ;;  %v423_v50 = vsel %vm409_vm0, %v420_v43, %v422_v47  ;;  %v426_v52 = vshrl.u32 %v713_v39, 16 }
  0xce   :  { %v427_v53 = vand.u32 65535, %v423_v50  ;;  %v428_v54 = vshrl.u32 %v423_v50, 16  ;;  %v450_v57 = vshrl.u32 %v419_v49, 16  ;;  %v449_v60 = vand.u32 65535, %v419_v49 }
  0xcf   :  { %v320_v59 = vadd.s32 536870912, %v319_v48  ;;  %v413_v8 = vsel %vm411_vm14, %v401_v35, 2102212464  ;;  %v392_v38 = vshrl.u32 %v597_v2, %v681_v62  ;;  %v315_v2 = vadd.s32 %v687_v21, %v705_v4 }
  0xd0   :  { %v430_v61 = vmul.u32 %v428_v54, %v425_v51  ;;  %v431_v0 = vmul.u32 %v427_v53, %v426_v52  ;;  %v452_v3 = vmul.u32 %v450_v57, %v425_v51  ;;  %v429_v5 = vmul.u32 %v427_v53, %v425_v51 }
  0xd1   :  { %v741_v1 = vshrl.u32 %v320_v59, 30  ;;  %v432_v10 = vmul.u32 %v428_v54, %v426_v52  ;;  %v451_v12 = vmul.u32 %v449_v60, %v425_v51  ;;  %v453_v16 = vmul.u32 %v449_v60, %v426_v52 }
  0xd2   :  { %v433_v6 = vshll.u32 %v430_v61, 16  ;;  %v455_v13 = vshll.u32 %v452_v3, 16  ;;  %v435_v15 = vshll.u32 %v431_v0, 16  ;;  %v434_v20 = vshrl.u32 %v430_v61, 16 }
  0xd3   :  { %v322_v9 = vshll.u32 %v741_v1, 30  ;;  %v454_v24 = vmul.u32 %v450_v57, %v426_v52  ;;  %v457_v29 = vshll.u32 %v453_v16, 16  ;;  %v436_v11 = vshrl.u32 %v431_v0, 16 }
  0xd4   :  { %vm437_vm1 = vc.u32 %v429_v5, %v433_v6  ;;  %v439_v63 = vadd.s32 %v433_v6, %v429_v5  ;;  %vm459_vm3 = vc.u32 %v451_v12, %v455_v13  ;;  %v461_v30 = vadd.s32 %v455_v13, %v451_v12 }
  0xd5   :  { %v323_v19 = vsub.s32 %v319_v48, %v322_v9  ;;  %v438_v22 = vsel %vm437_vm1, 1, %v603_v7  ;;  %v460_v27 = vsel %vm459_vm3, 1, %v603_v7  ;;  %v456_v14 = vshrl.u32 %v452_v3, 16 }
  0xd6   :  { %v440_v23 = vadd.s32 %v438_v22, %v432_v10  ;;  %vm441_vm2 = vc.u32 %v439_v63, %v435_v15  ;;  %v462_v31 = vadd.s32 %v460_v27, %v454_v24  ;;  %vm463_vm5 = vc.u32 %v461_v30, %v457_v29 }
  0xd7   :  { %vm324_vm4 = vcmp.lt.s32.totalorder %v323_v19, 0  ;;  %v325_v25 = vsub.s32 0, %v323_v19  ;;  %v442_v26 = vsel %vm441_vm2, 1, %v603_v7  ;;  %v464_v40 = vsel %vm463_vm5, 1, %v603_v7 }
  0xd8   :  { %v444_v28 = vadd.s32 %v442_v26, %v440_v23  ;;  %v466_v17 = vadd.s32 %v464_v40, %v462_v31  ;;  %v412_v43 = vsel %vm408_vm13, %v392_v38, %v699_v32  ;;  %v414_v56 = vsel %vm410_vm15, %v701_v33, %v413_v8 }
  0xd9   :  { %v326_v34 = vsel %vm324_vm4, %v325_v25, %v323_v19  ;;  %v458_v44 = vshrl.u32 %v453_v16, 16  ;;  %v465_v7 = vadd.s32 %v461_v30, %v457_v29  ;;  %v415_v49 = vsel %vm409_vm0, %v412_v43, %v414_v56 }
  0xda   :  { %v327_v36 = vclz %v326_v34  ;;  %v445_v37 = vadd.s32 %v444_v28, %v434_v20  ;;  %v467_v46 = vadd.s32 %v466_v17, %v456_v14  ;;  %v469_v53 = vmul.u32 %v713_v39, %v415_v49 }
  0xdb   :  { %vm223_vm8 = vcmp.lt.s32.totalorder %v647_v42, 0  ;;  %vm769_vm9 = vcmp.le.f32.partialorder %v221_v45, 0.7853982  ;;  %v345_v12 = vsub.s32 4, %v741_v1  ;;  %vm364_vm15 = vweird.f32 %v647_v42 }
  0xdc   :  { %v552_v41 = vadd.s32 4294967294, %v327_v36  ;;  %v446_v35 = vadd.s32 %v445_v37, %v436_v11  ;;  %v468_v50 = vadd.s32 %v467_v46, %v458_v44  ;;  %vm378_vm0 = vcmp.lt.s32.totalorder %v653_v55, 0 }
  0xdd   :  { %v346_v23 = vsel %vm223_vm8, %v345_v12, %v741_v1  ;;  %vm377_vm1 = vcmp.le.f32.partialorder %v376_v58, 0.7853982  ;;  %vm519_vm5 = vweird.f32 %v653_v55 }
  0xde   :  { %vm553_vm6 = vcmp.lt.s32.totalorder %v552_v41, 0  ;;  %vm471_vm7 = vc.u32 %v446_v35, %v465_v7  ;;  %v472_v33 = vadd.s32 1, %v468_v50  ;;  %v348_v26 = vsel %vm769_vm9, 0, %v346_v23 }
  0xdf   :  { %v330_v62 = vsel %vm553_vm6, 0, %v552_v41  ;;  %v470_v31 = vadd.s32 %v465_v7, %v446_v35  ;;  %v365_v37 = vadd.s32 3, %v348_v26 }
  0xe0   :  { %v331_v47 = vsub.s32 32, %v330_v62  ;;  %v335_v48 = vsub.s32 4294967266, %v330_v62  ;;  %v332_v32 = vshll.u32 %v323_v19, %v330_v62  ;;  %v473_v59 = vsel %vm471_vm7, %v472_v33, %v468_v50 }
  0xe1   :  { %v474_v60 = vadd.s32 %v473_v59, %v469_v53  ;;  %v366_v44 = vand.u32 3, %v365_v37 }
  0xe2   :  { %v333_v51 = vshrl.u32 %v315_v2, %v331_v47  ;;  %v336_v52 = vadd.s32 127, %v335_v48 }
  0xe3   :  { %v475_v4 = vadd.s32 536870912, %v474_v60  ;;  %vm368_vm12 = vcmp.eq.s32.totalorder %v366_v44, 0  ;;  %vm371_vm13 = vcmp.eq.s32.totalorder %v366_v44, 2  ;;  %vm367_vm14 = vcmp.lt.s32.totalorder %v366_v44, 2 }
  0xe4   :  { %v334_v54 = vor.u32 %v333_v51, %v332_v32  ;;  %v337_v57 = vshll.u32 %v336_v52, 23 }
  0xe5   :  { %v763_v3 = vshrl.u32 %v475_v4, 30 }
  0xe6   :  { %v338_v21 = vor.u32 4788187, %v337_v57  ;;  %v341_v0 = vcvt.s32.f32 %v334_v54 }
  0xe7   :  { %v477_v5 = vshll.u32 %v763_v3, 30  ;;  %v500_v53 = vsub.s32 4, %v763_v3 }
  0xe8   :  { %v339_v61 = vand.u32 2147483647, %v338_v21 }
  0xe9   :  { %v478_v9 = vsub.s32 %v474_v60, %v477_v5  ;;  %v501_v21 = vsel %vm378_vm0, %v500_v53, %v763_v3 }
  0xea   :  { %v342_v18 = vmul.f32 %v341_v0, %v339_v61  ;;  %v503_v61 = vsel %vm377_vm1, 0, %v501_v21 }
  0xeb   :  { %vm479_vm10 = vcmp.lt.s32.totalorder %v478_v9, 0  ;;  %v480_v15 = vsub.s32 0, %v478_v9 }
  0xec   :  { %v343_v6 = vxor.u32 2147483648, %v342_v18 }
  0xed   :  { %v481_v16 = vsel %vm479_vm10, %v480_v15, %v478_v9 }
  0xee   :  { %v344_v10 = vsel %vm223_vm8, %v343_v6, %v342_v18  ;;  %v482_v20 = vclz %v481_v16 }
  0xef   :  { %v347_v13 = vsel %vm769_vm9, %v647_v42, %v344_v10 }
  0xf0   :  { %v349_v63 = vmul.f32 %v347_v13, %v347_v13  ;;  %v555_v24 = vadd.s32 4294967294, %v482_v20 }
  0xf2   :  { %v357_v19 = vmul.f32 -0.00019511016, %v349_v63  ;;  %v350_v22 = vmul.f32 -0.001358992, %v349_v63  ;;  %vm556_vm11 = vcmp.lt.s32.totalorder %v555_v24, 0 }
  0xf3   :  { %v485_v29 = vsel %vm556_vm11, 0, %v555_v24 }
  0xf4   :  { %v358_v45 = vadd.f32 0.008332121, %v357_v19  ;;  %v351_v25 = vadd.f32 0.041655596, %v350_v22  ;;  %v486_v34 = vsub.s32 32, %v485_v29  ;;  %v490_v36 = vsub.s32 4294967266, %v485_v29 }
  0xf5   :  { %v487_v11 = vshll.u32 %v478_v9, %v485_v29  ;;  %v520_v9 = vadd.s32 3, %v503_v61 }
  0xf6   :  { %v359_v27 = vmul.f32 %v358_v45, %v349_v63  ;;  %v352_v28 = vmul.f32 %v351_v25, %v349_v63  ;;  %v488_v40 = vshrl.u32 %v470_v31, %v486_v34  ;;  %v491_v1 = vadd.s32 127, %v490_v36 }
  0xf8   :  { %v360_v30 = vadd.f32 -0.16666654, %v359_v27  ;;  %v353_v8 = vadd.f32 -0.4999988, %v352_v28  ;;  %v489_v17 = vor.u32 %v488_v40, %v487_v11  ;;  %v492_v43 = vshll.u32 %v491_v1, 23 }
  0xfa   :  { %v361_v38 = vmul.f32 %v360_v30, %v349_v63  ;;  %v354_v41 = vmul.f32 %v353_v8, %v349_v63  ;;  %v493_v2 = vor.u32 4788187, %v492_v43  ;;  %v496_v48 = vcvt.s32.f32 %v489_v17 }
  0xfc   :  { %v362_v14 = vadd.f32 1.0, %v361_v38  ;;  %v355_v56 = vadd.f32 1.0, %v354_v41  ;;  %v494_v47 = vand.u32 2147483647, %v493_v2 }
  0xfe   :  { %v363_v46 = vmul.f32 %v362_v14, %v347_v13  ;;  %v372_v62 = vxor.u32 2147483648, %v355_v56  ;;  %v497_v7 = vmul.f32 %v496_v48, %v494_v47  ;;  %v521_v13 = vand.u32 3, %v520_v9 }
 0x100   :  { %v369_v35 = vxor.u32 2147483648, %v363_v46  ;;  %v373_v50 = vsel %vm371_vm13, %v372_v62, %v363_v46  ;;  %v498_v51 = vxor.u32 2147483648, %v497_v7  ;;  %vm523_vm2 = vcmp.eq.s32.totalorder %v521_v13, 0 }
 0x101   :  { %vm526_vm3 = vcmp.eq.s32.totalorder %v521_v13, 2  ;;  %vm522_vm4 = vcmp.lt.s32.totalorder %v521_v13, 2 }
 0x102   :  { %v370_v49 = vsel %vm368_vm12, %v355_v56, %v369_v35  ;;  %v499_v33 = vsel %vm378_vm0, %v498_v51, %v497_v7 }
 0x103   :  { %v374_v32 = vsel %vm367_vm14, %v370_v49, %v373_v50  ;;  %v502_v54 = vsel %vm377_vm1, %v653_v55, %v499_v33 }
 0x104   :  { %v375_v52 = vsel %vm364_vm15, nan, %v374_v32  ;;  %v504_v57 = vmul.f32 %v502_v54, %v502_v54 }
 0x105   :  { %531 = vst [vmem:[#allocation2] sm:$0xff] %v375_v52 }
 0x106   :  { %v512_v59 = vmul.f32 -0.00019511016, %v504_v57  ;;  %v505_v60 = vmul.f32 -0.001358992, %v504_v57 }
 0x108   :  { %v513_v42 = vadd.f32 0.008332121, %v512_v59  ;;  %v506_v4 = vadd.f32 0.041655596, %v505_v60 }
 0x10a   :  { %v514_v0 = vmul.f32 %v513_v42, %v504_v57  ;;  %v507_v18 = vmul.f32 %v506_v4, %v504_v57 }
 0x10c   :  { %v515_v5 = vadd.f32 -0.16666654, %v514_v0  ;;  %v508_v6 = vadd.f32 -0.4999988, %v507_v18 }
 0x10e   :  { %v516_v39 = vmul.f32 %v515_v5, %v504_v57  ;;  %v509_v58 = vmul.f32 %v508_v6, %v504_v57 }
 0x110   :  { %v517_v10 = vadd.f32 1.0, %v516_v39  ;;  %v510_v12 = vadd.f32 1.0, %v509_v58 }
 0x112   :  { %v518_v15 = vmul.f32 %v517_v10, %v502_v54  ;;  %v527_v63 = vxor.u32 2147483648, %v510_v12 }
 0x114   :  { %v524_v3 = vxor.u32 2147483648, %v518_v15  ;;  %v528_v19 = vsel %vm526_vm3, %v527_v63, %v518_v15 }
 0x116   :  { %v525_v16 = vsel %vm523_vm2, %v510_v12, %v524_v3 }
 0x117   :  { %v529_v20 = vsel %vm522_vm4, %v525_v16, %v528_v19 }
 0x118   :  { %v530_v22 = vsel %vm519_vm5, nan, %v529_v20 }
 0x119   :  { %532 = vst [vmem:[#allocation2 + $0x8] sm:$0xff] %v530_v22 }
 0x11a   :  { %545 = dma.vmem_to_hbm [thread:$0]  %s538_s3, 256, %s540_s25, [#allocation3], %s605_s26, %s605_s26, %s606_s27  }
 0x11b   :  { %595 = dma.done.wait [#allocation3], 256  }
 0x11c   :  { %596 = vsyncadd [#allocation3], 4294967040 }
 0x11d   :  { %550 = vsyncpa [#allocation3], 1 }

</bundles_post_ra>
